<compile_context>
chip_gen: v6e
topology: v6e:2x2x1
jax: 0.10.0
libtpu: 0.0.40
codegen_flags: <defaults>
</compile_context>

<pallas_src>
import jax
import jax.numpy as jnp
from jax.experimental import pallas as pl
from jax.experimental.pallas import tpu as pltpu


def _davi_dropout_kernel(mask_ref, x_ref, o_ref):
    # mask_ref: (1, TN) shared mask block (constant row index -> stays resident).
    # x_ref / o_ref: (TM, TN) feature tiles, auto double-buffered by the pipeline.
    # The (1, TN) -> (TM, TN) sublane broadcast is free filler: this kernel is
    # purely HBM-bandwidth bound, nowhere near VPU bound.
    o_ref[...] = x_ref[...] * mask_ref[...]


_MIB = 1024 * 1024


def _vmem_budget_bytes() -> int:
    """Generation-aware scoped-VMEM budget (leaves ~30% headroom)."""
    try:
        physical = int(pltpu.get_tpu_info().vmem_capacity_bytes)
    except Exception:
        physical = 64 * _MIB  # conservative fallback: v7x has 64 MiB per TensorCore
    return (physical * 7) // 10


def _pick_tiles(rows: int, cols: int, dtype, per_buf_bytes: int):
    """(TM, TN) feature tile sized by bytes, sublane/lane aligned."""
    itemsize = jnp.dtype(dtype).itemsize
    sub = max(8, 32 // itemsize)  # sublane multiple: f32=8, bf16=16, int8=32
    # Lane tile: keep full `cols` unless even a minimal (sub, cols) tile blows
    # the per-buffer budget; then carve the lane axis in multiples of 128.
    if cols * sub * itemsize <= per_buf_bytes:
        tn = cols
    else:
        tn = max(128, ((per_buf_bytes // (sub * itemsize)) // 128) * 128)
        tn = min(tn, cols)
    # Row tile: fill the remaining per-buffer budget (no artificial row cap).
    tm = per_buf_bytes // max(tn * itemsize, 1)
    tm = max(sub, (tm // sub) * sub)
    if tm >= rows:
        tm = rows  # full row extent is always a legal block size
    return tm, tn


def davi_dropout(features: jax.Array, dropout: float, key: jax.Array) -> jax.Array:
    """features: [B, C, D]; dropout: drop probability in [0, 1]; key: PRNG key.

    Matches DaviDropout.forward: one Bernoulli(1 - dropout) mask of length D,
    repeated over B and C, multiplied into features (no rescaling).
    """
    assert features.ndim == 3, "expected features of shape [B, C, D]"
    B, C, D = features.shape

    # Fast path: eval-mode mask is all ones -> skip an entire HBM read+write pass.
    if float(dropout) <= 0.0:
        return features

    # torch: zeros(D).bernoulli_(1 - dropout)  -> keep-probability = 1 - dropout.
    keep_prob = 1.0 - float(dropout)
    mask_row = jax.random.bernoulli(key, p=keep_prob, shape=(D,)).astype(features.dtype)

    # Lane-dense layout: if D is narrower than a vreg's 128 lanes, fold the
    # channel axis into the lane axis (the shared mask just repeats C times),
    # so output stores are full `vst` instead of narrow masked `vst.msk`.
    if D < 128 and C > 1:
        rows, cols = B, C * D
        x2 = features.reshape(rows, cols)
        mask2 = jnp.tile(mask_row, C).reshape(1, cols)
    else:
        rows, cols = B * C, D
        x2 = features.reshape(rows, cols)
        mask2 = mask_row.reshape(1, D)

    vmem_budget = _vmem_budget_bytes()
    # Double-buffered in + out = 4 big buffers (+ the tiny mask); keep each
    # buffer <= ~8 MiB and within the per-generation budget.
    per_buf = min(8 * _MIB, vmem_budget // 5)
    tm, tn = _pick_tiles(rows, cols, features.dtype, per_buf)
    grid = (pl.cdiv(rows, tm), pl.cdiv(cols, tn))

    out2 = pl.pallas_call(
        _davi_dropout_kernel,
        out_shape=jax.ShapeDtypeStruct((rows, cols), features.dtype),
        grid=grid,
        in_specs=[
            # Shared (1, TN) mask block: constant row index, re-fetched only when
            # the lane-block index changes; VMEM cost ~2*TN*itemsize.
            # TODO(synk): pipeline_mode=pl.Buffered(1) would halve that ~1 KiB;
            # not worth the extra constraint for this kernel.
            pl.BlockSpec((1, tn), lambda i, j: (0, j)),
            pl.BlockSpec((tm, tn), lambda i, j: (i, j)),
        ],
        out_specs=pl.BlockSpec((tm, tn), lambda i, j: (i, j)),
        compiler_params=pltpu.CompilerParams(
            # Purely elementwise: every grid axis is independent.  On v7x this
            # lets the grid be sharded across the two TensorCores.
            # TODO(synk): verify 2-TC sharding on v7x; switch the leading axis to
            # pltpu.CORE_PARALLEL if plain "parallel" does not shard there.
            dimension_semantics=("parallel", "parallel"),
            vmem_limit_bytes=vmem_budget,
        ),
    )(mask2, x2)

    return out2.reshape(B, C, D)


if __name__ == "__main__":
    root = jax.random.PRNGKey(0)
    feat_key, mask_key = jax.random.split(root)

    def reference(features, dropout, key):
        # Same mask draw as the wrapper, broadcast over B and C (== torch repeat(B, C, 1)).
        mask = jax.random.bernoulli(key, p=1.0 - dropout, shape=(features.shape[2],))
        return features * mask.astype(features.dtype)[None, None, :]

    cases = [
        ((2, 4, 128), jnp.float32, 0.3),   # regular path (lane dim = 128)
        ((2, 4, 32), jnp.float32, 0.5),    # D < 128 -> channel axis folded into lanes
        ((2, 4, 128), jnp.bfloat16, 0.3),  # bf16 (16-row sublane multiple)
    ]
    for shape, dtype, drop in cases:
        features = jax.random.normal(feat_key, shape, dtype=jnp.float32).astype(dtype)
        out = jax.block_until_ready(davi_dropout(features, drop, mask_key))
        expected = reference(features, drop, mask_key)
        assert out.shape == features.shape and out.dtype == features.dtype
        assert bool(jnp.array_equal(out, expected)), (shape, str(dtype), drop)
        # Every element is either kept exactly or exactly zero, mask shared over B and C.
        assert bool(jnp.all((out == features) | (out == 0)))

    # dropout == 0 fast path (eval mode): identity, no kernel launch.
    features = jax.random.normal(feat_key, (2, 4, 128), dtype=jnp.float32)
    out0 = jax.block_until_ready(davi_dropout(features, 0.0, mask_key))
    assert bool(jnp.array_equal(out0, features))

    print("KERNEL_OK")
</pallas_src>

<mosaic_0001>
module attributes {stable_mosaic.version = 11 : i64} {
  func.func @_davi_dropout_kernel(%arg0: i32, %arg1: i32, %arg2: memref<1x128xf32, #tpu.memory_space<vmem>>, %arg3: memref<8x128xf32, #tpu.memory_space<vmem>>, %arg4: memref<8x128xf32, #tpu.memory_space<vmem>>) attributes {dimension_semantics = [#tpu.dimension_semantics<parallel>, #tpu.dimension_semantics<parallel>], iteration_bounds = array<i64: 1, 1>, scalar_prefetch = 0 : i64, scratch_operands = 0 : i64, tpu.core_type = #tpu.core_type<tc>, window_params = [{transform_indices = @transform_0, window_bounds = array<i64: 1, 128>}, {transform_indices = @transform_1, window_bounds = array<i64: 8, 128>}, {transform_indices = @transform_2, window_bounds = array<i64: 8, 128>}]} {
    %c0 = arith.constant 0 : index
    %c0_0 = arith.constant 0 : index
    %0 = vector.load %arg3[%c0, %c0_0] : memref<8x128xf32, #tpu.memory_space<vmem>>, vector<8x128xf32>
    %c0_1 = arith.constant 0 : index
    %c0_2 = arith.constant 0 : index
    %1 = vector.load %arg2[%c0_1, %c0_2] : memref<1x128xf32, #tpu.memory_space<vmem>>, vector<1x128xf32>
    %2 = vector.broadcast %1 : vector<1x128xf32> to vector<8x128xf32>
    %3 = arith.mulf %0, %2 : vector<8x128xf32>
    %c0_3 = arith.constant 0 : index
    %c0_4 = arith.constant 0 : index
    %4 = vector.load %arg4[%c0_3, %c0_4] : memref<8x128xf32, #tpu.memory_space<vmem>>, vector<8x128xf32>
    tpu.vector_store %arg4[%c0_3, %c0_4], %3 {strides = array<i32>} : memref<8x128xf32, #tpu.memory_space<vmem>>, vector<8x128xf32>,
    return
  }
  func.func @transform_0(%arg0: i32, %arg1: i32) -> (i32, i32) {
    %c0_i32 = arith.constant 0 : i32
    %c0_i32_0 = arith.constant 0 : i32
    return %c0_i32, %arg1 : i32, i32
  }
  func.func @transform_1(%arg0: i32, %arg1: i32) -> (i32, i32) {
    %c0_i32 = arith.constant 0 : i32
    return %arg0, %arg1 : i32, i32
  }
  func.func @transform_2(%arg0: i32, %arg1: i32) -> (i32, i32) {
    %c0_i32 = arith.constant 0 : i32
    return %arg0, %arg1 : i32, i32
  }
}

</mosaic_0001>

<bundles_post_ra>
// kernel: tpu_custom_call.1
= control target key start
LH: loop header
LB: loop body
LE: loop exit
PB: predicated region body
PF: predicated region fallthrough
CT: control target
= control target key end

     0   :  { %7 = vsyncpa [#allocation3], 0  ;;  %s159_s0 = inlined_call_operand.hbm [shape: f32[1,128], index: 0, kind: input, shape index: {}]   ;;  %s160_s1 = inlined_call_operand.hbm [shape: f32[8,128], index: 1, kind: input, shape index: {}]   ;;  %s161_s2 = inlined_call_operand.hbm [shape: f32[8,128], index: 2, kind: output, shape index: {}]  }
   0x1   :  { %8 = vsyncpa [#allocation6], 0 }
   0x2   :  { %9 = vsyncpa [#allocation4], 0  ;;  %s132_s9 = smov [#allocation2]   ;;  %s133_s11 = smov [#allocation5]  }
   0x3   :  { %s16_s10 = sshll.u32 %s132_s9, 4  ;;  %s26_s12 = sshll.u32 %s133_s11, 4  ;;  %s17_s10 = int_to_ptr.vmem [resolvable:$true] %s16_s10  ;;  %s27_s12 = int_to_ptr.vmem [resolvable:$true] %s26_s12 }
   0x4   :  { %s74_s13 = scalar_lea.vmem %s17_s10, 16  ;;  %s78_s14 = scalar_lea.vmem %s17_s10, 32 }
   0x5   :  { %p75_p0 = scmp.ne.s32.totalorder %s17_s10, %s74_s13  ;;  %p79_p1 = scmp.lt.s32.totalorder %s17_s10, %s17_s10 }
   0x6   :  { %p80_p2 = scmp.lt.s32.totalorder %s78_s14, %s74_s13 }
   0x8   :  { %p81_p3 = por %p80_p2, %p79_p1 }
   0xa   :  { %p82_p4 = pnand %p81_p3, %p75_p0 }
   0xc   :  { %85 = shalt.err (!%p82_p4)
}
   0xd   :  { %19 = dma.hbm_to_vmem [thread:$0]  %s159_s0, 16, %s17_s10, [#allocation3]  }
   0xe   :  { %s94_s17 = scalar_lea.vmem %s27_s12, 128  ;;  %p99_p6 = scmp.lt.s32.totalorder %s27_s12, %s27_s12 }
   0xf   :  { %p95_p5 = scmp.ne.s32.totalorder %s27_s12, %s94_s17  ;;  %p100_p7 = scmp.lt.s32.totalorder %s94_s17, %s94_s17 }
  0x11   :  { %p101_p8 = por %p100_p7, %p99_p6 }
  0x13   :  { %p102_p9 = pnand %p101_p8, %p95_p5 }
  0x15   :  { %105 = shalt.err (!%p102_p9)
}
  0x16   :  { %29 = dma.hbm_to_vmem [thread:$0]  %s160_s1, 128, %s27_s12, [#allocation6]  }
  0x17   :  { %126 = dma.done.wait [#allocation3], 16  }
  0x18   :  { %127 = vsyncadd [#allocation3], 4294967280 }
  0x19   :  { %128 = dma.done.wait [#allocation6], 128  }
  0x1a   :  { %129 = vsyncadd [#allocation6], 4294967168  ;;  %s134_s20 = smov [#allocation7]   ;;  %v36_v0 = vld [vmem:[#allocation5] sm:$0xff]  ;;  %v62_v1 = vld [vmem:[#allocation2] ss:$0 sm:$0xff] }
  0x1b   :  { %s52_s21 = sshll.u32 %s134_s20, 4  ;;  %v44_v2 = vmul.f32 %v62_v1, %v36_v0  ;;  %s53_s21 = int_to_ptr.vmem [resolvable:$true] %s52_s21 }
  0x1c   :  { %s106_s0 = scalar_lea.vmem %s53_s21, 128  ;;  %p111_p11 = scmp.lt.s32.totalorder %s53_s21, %s53_s21 }
  0x1d   :  { %45 = vst [vmem:[#allocation7] sm:$0xff] %v44_v2  ;;  %p107_p10 = scmp.ne.s32.totalorder %s53_s21, %s106_s0  ;;  %p112_p12 = scmp.lt.s32.totalorder %s106_s0, %s106_s0 }
  0x1f   :  { %p113_p13 = por %p112_p12, %p111_p11 }
  0x21   :  { %p114_p0 = pnand %p113_p13, %p107_p10 }
  0x23   :  { %117 = shalt.err (!%p114_p0)
}
  0x24   :  { %55 = dma.vmem_to_hbm [thread:$0]  %s53_s21, 128, %s161_s2, [#allocation4]  }
  0x25   :  { %130 = dma.done.wait [#allocation4], 128  }
  0x26   :  { %131 = vsyncadd [#allocation4], 4294967168 }
  0x27   :  { %59 = vsyncpa [#allocation3], 1 }
  0x28   :  { %60 = vsyncpa [#allocation6], 1 }
  0x29   :  { %61 = vsyncpa [#allocation4], 1 }

</bundles_post_ra>
